<compile_context>
chip_gen: v6e
topology: v6e:2x2x1
jax: 0.10.0
libtpu: 0.0.40
codegen_flags: <defaults>
</compile_context>

<pallas_src>
import math
import jax
import jax.numpy as jnp
from jax.experimental import pallas as pl
from jax.experimental.pallas import tpu as pltpu


_LOG_SQRT_2PI = 0.5 * math.log(2.0 * math.pi)


def _round_up(n: int, m: int) -> int:
    return ((n + m - 1) // m) * m


def make_policy_kernel(action_bound: float, ad_pad: int):
    def policy_kernel(x_ref, w1t_ref, b1_ref, wht_ref, bht_ref, eps_ref, out_ref):
        # Batch rides the lane axis: every activation is (features, tb).
        x = x_ref[...]                                              # (state_dim, tb)

        # fc1 + ReLU (MXU matmul, f32 accumulate): h = W1^T @ x -> (hidden, tb)
        h = jnp.dot(w1t_ref[...], x, preferred_element_type=jnp.float32)
        h = jnp.maximum(h + b1_ref[...], 0.0)

        # Fused (mu | std) heads in one matmul -> (2*ad_pad, tb); each head is a full
        # 8-sublane group so the split below is layout-preserving.
        heads = jnp.dot(wht_ref[...], h, preferred_element_type=jnp.float32)
        heads = heads + bht_ref[...]
        mu = heads[:ad_pad, :]
        std = jnp.logaddexp(heads[ad_pad:, :], 0.0)  # numerically stable softplus

        # rsample = mu + std * eps, eps ~ N(0, 1) (supplied)
        eps = eps_ref[...]
        z = mu + std * eps

        # Normal(mu, std).log_prob(z); (z - mu)/std == eps algebraically -> no divide.
        log_prob = -0.5 * jnp.square(eps) - jnp.log(std) - _LOG_SQRT_2PI

        # action = tanh(z). NOTE: the PyTorch reference applies tanh AGAIN inside the
        # Jacobian correction (tanh(action)); reproduced exactly for parity.
        action = jnp.tanh(z)
        t = jnp.tanh(action)
        log_prob = log_prob - jnp.log1p(1e-07 - t * t)

        # Single lane-dense packed store: rows [0:ad_pad) = scaled action,
        # rows [ad_pad:2*ad_pad) = log_prob.
        out_ref[...] = jnp.concatenate([action * action_bound, log_prob], axis=0)

    return policy_kernel


def _choose_batch_tile(B: int, batch_tile=None, max_tile: int = 2048):
    """Lane-aligned batch tile (multiple of 128) + padded batch size.

    Padding (instead of a divisor search / tb=B fallback) guarantees no dropped rows,
    a bounded per-tile VMEM footprint, and -- when the batch allows it -- a >=2 step
    grid so v7x's two TensorCores both get work.
    """
    if batch_tile is None:
        tb = min(max_tile, _round_up(max(B, 1), 128))
        while tb > 128 and (B + tb - 1) // tb < 2:
            tb = max(128, _round_up(tb // 2, 128))
    else:
        tb = _round_up(int(batch_tile), 128)
    return tb, _round_up(B, tb)


def policy_net_forward(x, fused_params, eps, action_bound, *, batch_tile=None):
    """Whole PolicyNet forward in one Pallas kernel, gridded over the (padded) batch.

    x: (B, state_dim), eps: (B, action_dim)  ->  action, log_prob: (B, action_dim).
    """
    w1t, b1, wht, bht, action_dim, ad_pad = fused_params
    B, state_dim = x.shape
    hidden_dim = w1t.shape[0]
    two_ad = wht.shape[0]  # 2 * ad_pad

    tb, B_pad = _choose_batch_tile(B, batch_tile)
    grid = (B_pad // tb,)

    # Pad the batch and put it on the lane axis (cheap XLA layout plumbing outside the
    # kernel). Padded rows/cols are zeros; all tail math stays finite on them.
    x_t = jnp.pad(x, ((0, B_pad - B), (0, 0))).T                            # (state_dim, B_pad)
    eps_t = jnp.pad(eps, ((0, B_pad - B), (0, ad_pad - action_dim))).T      # (ad_pad,   B_pad)

    kernel = make_policy_kernel(action_bound, ad_pad)

    def resident(shape):
        # Weights stay VMEM-resident across all batch tiles.
        return pl.BlockSpec(shape, lambda i: (0, 0))

    packed = pl.pallas_call(
        kernel,
        out_shape=jax.ShapeDtypeStruct((two_ad, B_pad), jnp.float32),
        grid_spec=pltpu.PrefetchScalarGridSpec(
            num_scalar_prefetch=0,
            grid=grid,
            in_specs=[
                pl.BlockSpec((state_dim, tb), lambda i: (0, i)),   # x^T    (streamed)
                resident((hidden_dim, state_dim)),                 # W1^T
                resident((hidden_dim, 1)),                         # b1
                resident((two_ad, hidden_dim)),                    # (Wmu|Wstd)^T fused + padded
                resident((two_ad, 1)),                             # (bmu|bstd)  fused + padded
                pl.BlockSpec((ad_pad, tb), lambda i: (0, i)),      # eps^T  (streamed)
            ],
            out_specs=pl.BlockSpec((two_ad, tb), lambda i: (0, i)),
        ),
        compiler_params=pltpu.CompilerParams(
            dimension_semantics=("parallel",),
        ),
    )(x_t, w1t, b1, wht, bht, eps_t)

    action = packed[:action_dim, :B].T
    log_prob = packed[ad_pad:ad_pad + action_dim, :B].T
    return action, log_prob


def init_params(key, state_dim, hidden_dim, action_dim):
    """Deterministic PyTorch-Linear-style uniform init, weights stored [in, out]."""
    ks = jax.random.split(key, 6)

    def lin(kw, kb, fan_in, fan_out):
        bound = 1.0 / math.sqrt(fan_in)
        w = jax.random.uniform(kw, (fan_in, fan_out), jnp.float32, -bound, bound)
        b = jax.random.uniform(kb, (1, fan_out), jnp.float32, -bound, bound)
        return w, b

    w1, b1 = lin(ks[0], ks[1], state_dim, hidden_dim)
    wmu, bmu = lin(ks[2], ks[3], hidden_dim, action_dim)
    wstd, bstd = lin(ks[4], ks[5], hidden_dim, action_dim)
    return (w1, b1, wmu, bmu, wstd, bstd)


def fuse_heads(params, action_dim):
    """One-time weight transform for the batch-on-lane kernel layout.

    Transposes everything to (out, in), pads each head to a full 8-sublane group
    (so the in-kernel mu/std split and the action|log_prob concatenate are
    layout-preserving), and packs the mu|std heads for one matmul.
    """
    w1, b1, wmu, bmu, wstd, bstd = params
    ad_pad = _round_up(action_dim, 8)

    def pad_head_t(w, b):
        wt = jnp.pad(w.T, ((0, ad_pad - action_dim), (0, 0)))          # (ad_pad, hidden)
        bt = jnp.pad(b.reshape(-1, 1), ((0, ad_pad - action_dim), (0, 0)))
        return wt, bt

    wmu_t, bmu_t = pad_head_t(wmu, bmu)
    wstd_t, bstd_t = pad_head_t(wstd, bstd)

    w1t = w1.T                                    # (hidden, state_dim)
    b1t = b1.reshape(-1, 1)                       # (hidden, 1)
    wht = jnp.concatenate([wmu_t, wstd_t], axis=0)    # (2*ad_pad, hidden)
    bht = jnp.concatenate([bmu_t, bstd_t], axis=0)    # (2*ad_pad, 1)
    return (w1t, b1t, wht, bht, action_dim, ad_pad)


if __name__ == "__main__":
    # Small shapes implied by the module: (batch, state_dim) -> hidden -> action_dim
    B, state_dim, hidden_dim, action_dim = 8, 8, 32, 4
    action_bound = 2.0

    key = jax.random.PRNGKey(0)
    k_x, k_p, k_eps = jax.random.split(key, 3)

    x = jax.random.normal(k_x, (B, state_dim), jnp.float32)
    params = init_params(k_p, state_dim, hidden_dim, action_dim)
    eps = jax.random.normal(k_eps, (B, action_dim), jnp.float32)

    fused = fuse_heads(params, action_dim)
    action, log_prob = policy_net_forward(x, fused, eps, action_bound)
    jax.block_until_ready((action, log_prob))

    # Pure-JAX reference of the exact (un-fused) PolicyNet forward math.
    w1, b1, wmu, bmu, wstd, bstd = params
    h = jax.nn.relu(x @ w1 + b1)
    mu = h @ wmu + bmu
    std = jax.nn.softplus(h @ wstd + bstd)
    z = mu + std * eps
    lp = -0.5 * ((z - mu) / std) ** 2 - jnp.log(std) - 0.5 * math.log(2 * math.pi)
    a = jnp.tanh(z)
    lp = lp - jnp.log(1.0 - jnp.tanh(a) ** 2 + 1e-07)
    a_ref = a * action_bound

    assert action.shape == (B, action_dim) and log_prob.shape == (B, action_dim)
    assert jnp.allclose(action, a_ref, atol=1e-5, rtol=1e-5), "action mismatch"
    assert jnp.allclose(log_prob, lp, atol=1e-4, rtol=1e-4), "log_prob mismatch"

    print("KERNEL_OK")
</pallas_src>

<mosaic_0001>
module attributes {stable_mosaic.version = 11 : i64} {
  func.func @policy_kernel(%arg0: i32, %arg1: memref<8x128xf32, #tpu.memory_space<vmem>>, %arg2: memref<32x8xf32, #tpu.memory_space<vmem>>, %arg3: memref<32x1xf32, #tpu.memory_space<vmem>>, %arg4: memref<16x32xf32, #tpu.memory_space<vmem>>, %arg5: memref<16x1xf32, #tpu.memory_space<vmem>>, %arg6: memref<8x128xf32, #tpu.memory_space<vmem>>, %arg7: memref<16x128xf32, #tpu.memory_space<vmem>>) attributes {dimension_semantics = [#tpu.dimension_semantics<parallel>], iteration_bounds = array<i64: 1>, scalar_prefetch = 0 : i64, scratch_operands = 0 : i64, tpu.core_type = #tpu.core_type<tc>, window_params = [{transform_indices = @transform_0, window_bounds = array<i64: 8, 128>}, {pipeline_mode = #tpu.pipeline_mode<synchronous>, transform_indices = @transform_1, window_bounds = array<i64: 32, 8>}, {pipeline_mode = #tpu.pipeline_mode<synchronous>, transform_indices = @transform_2, window_bounds = array<i64: 32, 1>}, {pipeline_mode = #tpu.pipeline_mode<synchronous>, transform_indices = @transform_3, window_bounds = array<i64: 16, 32>}, {pipeline_mode = #tpu.pipeline_mode<synchronous>, transform_indices = @transform_4, window_bounds = array<i64: 16, 1>}, {transform_indices = @transform_5, window_bounds = array<i64: 8, 128>}, {transform_indices = @transform_6, window_bounds = array<i64: 16, 128>}]} {
    %c0 = arith.constant 0 : index
    %c0_0 = arith.constant 0 : index
    %0 = vector.load %arg1[%c0, %c0_0] : memref<8x128xf32, #tpu.memory_space<vmem>>, vector<8x128xf32>
    %c0_1 = arith.constant 0 : index
    %c0_2 = arith.constant 0 : index
    %1 = vector.load %arg2[%c0_1, %c0_2] : memref<32x8xf32, #tpu.memory_space<vmem>>, vector<32x8xf32>
    %cst = arith.constant dense<0.000000e+00> : vector<32x128xf32>
    %2 = tpu.matmul %1, %0, %cst {dimension_numbers = #tpu.dot_dimension_numbers<[1], [0], [0], [1], [0, 0, 1, 1], [], []>} : vector<32x8xf32>, vector<8x128xf32>, vector<32x128xf32> -> vector<32x128xf32>
    %c0_3 = arith.constant 0 : index
    %c0_4 = arith.constant 0 : index
    %3 = vector.load %arg3[%c0_3, %c0_4] : memref<32x1xf32, #tpu.memory_space<vmem>>, vector<32x1xf32>
    %4 = vector.broadcast %3 : vector<32x1xf32> to vector<32x128xf32>
    %5 = arith.addf %2, %4 : vector<32x128xf32>
    %cst_5 = arith.constant 0.000000e+00 : f32
    %6 = vector.broadcast %cst_5 : f32 to vector<32x128xf32>
    %7 = arith.maximumf %5, %6 : vector<32x128xf32>
    %c0_6 = arith.constant 0 : index
    %c0_7 = arith.constant 0 : index
    %8 = vector.load %arg4[%c0_6, %c0_7] : memref<16x32xf32, #tpu.memory_space<vmem>>, vector<16x32xf32>
    %cst_8 = arith.constant dense<0.000000e+00> : vector<16x128xf32>
    %9 = tpu.matmul %8, %7, %cst_8 {dimension_numbers = #tpu.dot_dimension_numbers<[1], [0], [0], [1], [0, 0, 1, 1], [], []>} : vector<16x32xf32>, vector<32x128xf32>, vector<16x128xf32> -> vector<16x128xf32>
    %c0_9 = arith.constant 0 : index
    %c0_10 = arith.constant 0 : index
    %10 = vector.load %arg5[%c0_9, %c0_10] : memref<16x1xf32, #tpu.memory_space<vmem>>, vector<16x1xf32>
    %11 = vector.broadcast %10 : vector<16x1xf32> to vector<16x128xf32>
    %12 = arith.addf %9, %11 : vector<16x128xf32>
    %13 = vector.extract_strided_slice %12 {offsets = [0, 0], sizes = [8, 128], strides = [1, 1]} : vector<16x128xf32> to vector<8x128xf32>
    %14 = vector.extract_strided_slice %12 {offsets = [8, 0], sizes = [8, 128], strides = [1, 1]} : vector<16x128xf32> to vector<8x128xf32>
    %cst_11 = arith.constant 0.000000e+00 : f32
    %15 = vector.broadcast %cst_11 : f32 to vector<8x128xf32>
    %16 = arith.maximumf %14, %15 : vector<8x128xf32>
    %17 = vector.broadcast %cst_11 : f32 to vector<8x128xf32>
    %18 = arith.subf %14, %17 : vector<8x128xf32>
    %19 = arith.cmpf one, %18, %18 : vector<8x128xf32>
    %20 = vector.broadcast %cst_11 : f32 to vector<8x128xf32>
    %21 = arith.addf %14, %20 : vector<8x128xf32>
    %22 = math.absf %18 : vector<8x128xf32>
    %cst_12 = arith.constant 0.000000e+00 : f32
    %23 = vector.broadcast %cst_12 : f32 to vector<8x128xf32>
    %24 = arith.subf %23, %22 : vector<8x128xf32>
    %25 = math.exp %24 : vector<8x128xf32>
    %26 = math.log1p %25 : vector<8x128xf32>
    %27 = arith.addf %16, %26 : vector<8x128xf32>
    %28 = arith.select %19, %21, %27 : vector<8x128xi1>, vector<8x128xf32>
    %c0_13 = arith.constant 0 : index
    %c0_14 = arith.constant 0 : index
    %29 = vector.load %arg6[%c0_13, %c0_14] : memref<8x128xf32, #tpu.memory_space<vmem>>, vector<8x128xf32>
    %30 = arith.mulf %28, %29 : vector<8x128xf32>
    %31 = arith.addf %13, %30 : vector<8x128xf32>
    %32 = arith.mulf %29, %29 : vector<8x128xf32>
    %cst_15 = arith.constant -5.000000e-01 : f32
    %33 = vector.broadcast %cst_15 : f32 to vector<8x128xf32>
    %34 = arith.mulf %33, %32 : vector<8x128xf32>
    %35 = math.log %28 : vector<8x128xf32>
    %36 = arith.subf %34, %35 : vector<8x128xf32>
    %cst_16 = arith.constant 0.918938517 : f32
    %37 = vector.broadcast %cst_16 : f32 to vector<8x128xf32>
    %38 = arith.subf %36, %37 : vector<8x128xf32>
    %39 = math.tanh %31 : vector<8x128xf32>
    %40 = math.tanh %39 : vector<8x128xf32>
    %41 = arith.mulf %40, %40 : vector<8x128xf32>
    %cst_17 = arith.constant 1.000000e-07 : f32
    %42 = vector.broadcast %cst_17 : f32 to vector<8x128xf32>
    %43 = arith.subf %42, %41 : vector<8x128xf32>
    %44 = math.log1p %43 : vector<8x128xf32>
    %45 = arith.subf %38, %44 : vector<8x128xf32>
    %cst_18 = arith.constant 2.000000e+00 : f32
    %46 = vector.broadcast %cst_18 : f32 to vector<8x128xf32>
    %47 = arith.mulf %39, %46 : vector<8x128xf32>
    %48 = tpu.concatenate %47, %45 in 0 : vector<8x128xf32>, vector<8x128xf32> -> vector<16x128xf32>
    %c0_19 = arith.constant 0 : index
    %c0_20 = arith.constant 0 : index
    %49 = vector.load %arg7[%c0_19, %c0_20] : memref<16x128xf32, #tpu.memory_space<vmem>>, vector<16x128xf32>
    tpu.vector_store %arg7[%c0_19, %c0_20], %48 {strides = array<i32>} : memref<16x128xf32, #tpu.memory_space<vmem>>, vector<16x128xf32>,
    return
  }
  func.func @transform_0(%arg0: i32) -> (i32, i32) {
    %c0_i32 = arith.constant 0 : i32
    %c0_i32_0 = arith.constant 0 : i32
    return %c0_i32, %arg0 : i32, i32
  }
  func.func @transform_1(%arg0: i32) -> (i32, i32) {
    %c0_i32 = arith.constant 0 : i32
    %c0_i32_0 = arith.constant 0 : i32
    %c0_i32_1 = arith.constant 0 : i32
    return %c0_i32, %c0_i32_0 : i32, i32
  }
  func.func @transform_2(%arg0: i32) -> (i32, i32) {
    %c0_i32 = arith.constant 0 : i32
    %c0_i32_0 = arith.constant 0 : i32
    %c0_i32_1 = arith.constant 0 : i32
    return %c0_i32, %c0_i32_0 : i32, i32
  }
  func.func @transform_3(%arg0: i32) -> (i32, i32) {
    %c0_i32 = arith.constant 0 : i32
    %c0_i32_0 = arith.constant 0 : i32
    %c0_i32_1 = arith.constant 0 : i32
    return %c0_i32, %c0_i32_0 : i32, i32
  }
  func.func @transform_4(%arg0: i32) -> (i32, i32) {
    %c0_i32 = arith.constant 0 : i32
    %c0_i32_0 = arith.constant 0 : i32
    %c0_i32_1 = arith.constant 0 : i32
    return %c0_i32, %c0_i32_0 : i32, i32
  }
  func.func @transform_5(%arg0: i32) -> (i32, i32) {
    %c0_i32 = arith.constant 0 : i32
    %c0_i32_0 = arith.constant 0 : i32
    return %c0_i32, %arg0 : i32, i32
  }
  func.func @transform_6(%arg0: i32) -> (i32, i32) {
    %c0_i32 = arith.constant 0 : i32
    %c0_i32_0 = arith.constant 0 : i32
    return %c0_i32, %arg0 : i32, i32
  }
}

</mosaic_0001>

<bundles_post_ra>
// kernel: tpu_custom_call.1
= control target key start
LH: loop header
LB: loop body
LE: loop exit
PB: predicated region body
PF: predicated region fallthrough
CT: control target
= control target key end

     0   :  { %vm53_vm0 = vcmask 64512   ;;  %v388_v5 = vmov 0   ;;  %s478_s0 = inlined_call_operand.vmem [shape: f32[8,128], index: 0, kind: input, shape index: {}]   ;;  %s479_s1 = inlined_call_operand.vmem [shape: f32[32,8], index: 1, kind: input, shape index: {}]   ;;  %s480_s2 = inlined_call_operand.vmem [shape: f32[32,1], index: 2, kind: input, shape index: {}]   ;;  %s481_s3 = inlined_call_operand.vmem [shape: f32[16,32], index: 3, kind: input, shape index: {}]   ;;  %s482_s4 = inlined_call_operand.vmem [shape: f32[16,1], index: 4, kind: input, shape index: {}]   ;;  %s483_s5 = inlined_call_operand.vmem [shape: f32[8,128], index: 5, kind: input, shape index: {}]   ;;  %s484_s6 = inlined_call_operand.hbm [shape: f32[16,128], index: 6, kind: output, shape index: {}]  }
   0x1   :  { %v24_v0 = vld [vmem:[%s478_s0] sm:$0xff]  ;;  %v26_v2 = vld [vmem:[%s479_s1 + $0x8] sm:$0xff]  ;;  %v27_v3 = vld [vmem:[%s479_s1 + $0x10] sm:$0xff]  ;;  %352 = vset.pattern.permute.xlu0 %v388_v5 }
   0x2   :  { %v25_v1 = vld [vmem:[%s479_s1] sm:$0xff]  ;;  %329 = vmatprep.subr.mxu0 %v24_v0  ;;  %v32_v4 = vld [vmem:[%s480_s2 + $0x18] sm:$0xff]  ;;  %v30_v6 = vld [vmem:[%s480_s2 + $0x8] sm:$0xff] }
   0x3   :  { %331 = vmatprep.mubr.msk.f32.mxu0 %vm53_vm0, %v25_v1  ;;  %330 = vmatpush3.msra.mxu0 %v24_v0 }
   0x4   :  { %332 = vmatmul.mubr.msk.f32.vlgmr.msra.gmra.mxu0 %vm53_vm0, %v26_v2  ;;  %50 = vperm.xlu0 %352, %v32_v4  }
   0x5   :  { %11 = vsyncpa [#allocation3], 0  ;;  %334 = vmatprep.mubr.msk.f32.mxu0 %vm53_vm0, %v27_v3  ;;  %v28_v7 = vld [vmem:[%s479_s1 + $0x18] sm:$0xff]  ;;  %353 = vset.pattern.permute.xlu1 %v388_v5  ;;  %v31_v8 = vld [vmem:[%s480_s2 + $0x10] sm:$0xff]  ;;  %vm169_vm1 = vcmask 261120  }
   0x6   :  { %40 = vperm.xlu1 %353, %v30_v6   ;;  %v29_v9 = vld [vmem:[%s480_s2] sm:$0xff]  ;;  %v158_v10 = vld [vmem:[%s482_s4 + $0x8] sm:$0xff] }
   0x7   :  { %v157_v11 = vld [vmem:[%s482_s4] sm:$0xff]  ;;  %v156_v29 = vld [vmem:[%s481_s3 + $0x8] sm:$0xff] }
   0x8   :  { %335 = vmatmul.mubr.msk.f32.gmra.mxu0 %vm53_vm0, %v28_v7  ;;  %45 = vperm.xlu0 %352, %v31_v8   ;;  %v155_v12 = vld [vmem:[%s481_s3] sm:$0xff] }
   0x9   :  { %345 = vmatprep.mubr.msk.f32.mxu1 %vm169_vm1, %v155_v12  ;;  %v269_v48 = vld [vmem:[%s483_s5] sm:$0xff]  ;;  %s389_s5 = smov [#allocation2]  }
   0xa   :  { %35 = vperm.xlu1 %353, %v29_v9   ;;  %v272_v60 = vmul.f32 %v269_v48, %v269_v48  ;;  %s300_s20 = sshll.u32 %s389_s5, 4  ;;  %s301_s20 = int_to_ptr.vmem [resolvable:$true] %s300_s20 }
   0xb   :  { %s366_s21 = scalar_lea.vmem %s301_s20, 256  ;;  %p371_p1 = scmp.lt.s32.totalorder %s301_s20, %s301_s20 }
   0xc   :  { %166 = vperm.xlu0 %352, %v158_v10   ;;  %v273_v63 = vmul.f32 -0.5, %v272_v60  ;;  %p367_p0 = scmp.ne.s32.totalorder %s301_s20, %s366_s21  ;;  %p372_p2 = scmp.lt.s32.totalorder %s366_s21, %s366_s21 }
   0xe   :  { %161 = vperm.xlu1 %353, %v157_v11   ;;  %p373_p3 = por %p372_p2, %p371_p1 }
  0x10   :  { %p374_p4 = pnand %p373_p3, %p367_p0 }
  0x7f   :  { %v51_v13 = vpop.permute.xlu0 %50 }
  0x81   :  { %v41_v14 = vpop.permute.xlu1 %40 }
  0x83   :  { %v46_v18 = vpop.permute.xlu0 %45 }
  0x85   :  { %v36_v20 = vpop.permute.xlu1 %35 }
  0x87   :  { %v167_v30 = vpop.permute.xlu0 %166 }
  0x89   :  { %v162_v49 = vpop.permute.xlu1 %161 }
  0xc4   :  { %v333_v15 = vpop.f32.mrf.mxu0 }
  0xc5   :  { %v138_v22 = vadd.f32 %v333_v15, %v41_v14 }
  0xc6   :  { %v132_v16 = vpop.f32.mrf.mxu0 }
  0xc7   :  { %v133_v25 = vadd.f32 %v132_v16, %v36_v20  ;;  %v152_v27 = vmax.f32 %v138_v22, 0.0 }
  0xc8   :  { %v336_v17 = vpop.f32.mrf.mxu0 }
  0xc9   :  { %v148_v19 = vadd.f32 %v336_v17, %v51_v13  ;;  %v151_v28 = vmax.f32 %v133_v25, 0.0 }
  0xca   :  { %v142_v21 = vpop.f32.mrf.mxu0 }
  0xcb   :  { %v154_v23 = vmax.f32 %v148_v19, 0.0  ;;  %v143_v24 = vadd.f32 %v142_v21, %v46_v18 }
  0xcd   :  { %v153_v26 = vmax.f32 %v143_v24, 0.0  ;;  %337 = vmatprep.subr.mxu1 %v154_v23 }
  0xce   :  { %338 = vmatpush3.msra.mxu1 %v154_v23 }
  0xcf   :  { %339 = vmatprep.subr.mxu1 %v153_v26 }
  0xd0   :  { %340 = vmatpush3.msra.mxu1 %v153_v26 }
  0xd1   :  { %341 = vmatprep.subr.mxu1 %v152_v27 }
  0xd2   :  { %342 = vmatpush3.msra.mxu1 %v152_v27 }
  0xd3   :  { %343 = vmatprep.subr.mxu1 %v151_v28 }
  0xd4   :  { %344 = vmatpush3.msra.mxu1 %v151_v28 }
  0xd5   :  { %346 = vmatmul.mubr.msk.f32.vlgmr.msra.gmra.mxu1 %vm169_vm1, %v156_v29 }
 0x195   :  { %v347_v31 = vpop.f32.mrf.mxu1 }
 0x196   :  { %v248_v32 = vadd.f32 %v347_v31, %v167_v30 }
 0x197   :  { %v242_v46 = vpop.f32.mrf.mxu1 }
 0x198   :  { %v254_v33 = vand.u32 2147483647, %v248_v32  ;;  %v251_v44 = vmax.f32 %v248_v32, 0.0  ;;  %vm252_vm3 = vcmp.ne.f32.partialorder %v248_v32, %v248_v32  ;;  %v243_v51 = vadd.f32 %v242_v46, %v162_v49 }
 0x19a   :  { %v255_v34 = vsub.f32 0.0, %v254_v33 }
 0x19c   :  { %v256_v35 = vmul.f32 1.442695, %v255_v34 }
 0x19e   :  { %354 = vpow2.f32 %v256_v35 }
 0x1ab   :  { %v355_v36 = vpop.eup %354 }
 0x1ac   :  { %v258_v37 = vadd.f32 1.0, %v355_v36  ;;  %v261_v38 = vmul.f32 -0.5, %v355_v36  ;;  %v264_v40 = vand.u32 2147483647, %v355_v36 }
 0x1ae   :  { %356 = vlog2.f32 %v258_v37  ;;  %v262_v39 = vadd.f32 1.0, %v261_v38  ;;  %vm265_vm2 = vcmp.lt.f32.partialorder %v264_v40, 0.0004427343 }
 0x1b0   :  { %v263_v43 = vmul.f32 %v355_v36, %v262_v39 }
 0x1bb   :  { %v357_v41 = vpop.eup %356 }
 0x1bc   :  { %v260_v42 = vmul.f32 0.6931472, %v357_v41 }
 0x1be   :  { %v266_v45 = vsel %vm265_vm2, %v263_v43, %v260_v42 }
 0x1bf   :  { %v267_v47 = vadd.f32 %v266_v45, %v251_v44 }
 0x1c1   :  { %v268_v50 = vsel %vm252_vm3, %v248_v32, %v267_v47 }
 0x1c2   :  { %v270_v52 = vmul.f32 %v269_v48, %v268_v50 }
 0x1c4   :  { %v271_v53 = vadd.f32 %v270_v52, %v243_v51 }
 0x1c6   :  { %358 = vtanh.f32 %v271_v53 }
 0x1d3   :  { %v359_v54 = vpop.eup %358 }
 0x1d4   :  { %360 = vtanh.f32 %v359_v54  ;;  %v292_v55 = vmul.f32 2.0, %v359_v54 }
 0x1d5   :  { %362 = vlog2.f32 %v268_v50 }
 0x1d6   :  { %293 = vst [vmem:[#allocation2] sm:$0xff] %v292_v55 }
 0x1e1   :  { %v361_v56 = vpop.eup %360 }
 0x1e2   :  { %v280_v57 = vmul.f32 %v361_v56, %v361_v56  ;;  %v363_v61 = vpop.eup %362 }
 0x1e3   :  { %v275_v0 = vmul.f32 0.6931472, %v363_v61 }
 0x1e4   :  { %v281_v58 = vsub.f32 1e-07, %v280_v57 }
 0x1e5   :  { %v276_v2 = vsub.f32 %v273_v63, %v275_v0 }
 0x1e6   :  { %v282_v59 = vadd.f32 1.0, %v281_v58  ;;  %v285_v62 = vmul.f32 -0.5, %v281_v58  ;;  %v288_v3 = vand.u32 2147483647, %v281_v58 }
 0x1e7   :  { %v317_v7 = vadd.f32 -0.9189385, %v276_v2 }
 0x1e8   :  { %364 = vlog2.f32 %v282_v59  ;;  %v286_v1 = vadd.f32 1.0, %v285_v62  ;;  %vm289_vm4 = vcmp.lt.f32.partialorder %v288_v3, 0.0004427343 }
 0x1ea   :  { %v287_v6 = vmul.f32 %v286_v1, %v281_v58 }
 0x1f5   :  { %v365_v4 = vpop.eup %364 }
 0x1f6   :  { %v284_v5 = vmul.f32 0.6931472, %v365_v4 }
 0x1f8   :  { %v290_v8 = vsel %vm289_vm4, %v287_v6, %v284_v5 }
 0x1f9   :  { %v291_v9 = vsub.f32 %v317_v7, %v290_v8 }
 0x1fb   :  { %294 = vst [vmem:[#allocation2 + $0x8] sm:$0xff] %v291_v9 }
 0x1fc   :  { %377 = shalt.err (!%p374_p4)
}
 0x1fd   :  { %s390_s22 = smov 128   ;;  %s391_s23 = smov 8  }
 0x1fe   :  { %306 = dma.vmem_to_hbm [thread:$0]  %s301_s20, 256, %s484_s6, [#allocation3], %s390_s22, %s390_s22, %s391_s23  }
 0x1ff   :  { %386 = dma.done.wait [#allocation3], 256  }
 0x200   :  { %387 = vsyncadd [#allocation3], 4294967040 }
 0x201   :  { %310 = vsyncpa [#allocation3], 1 }

</bundles_post_ra>
